<compile_context>
chip_gen: v6e
topology: v6e:2x2x1
jax: 0.10.0
libtpu: 0.0.40
codegen_flags: <defaults>
</compile_context>

<pallas_src>
import jax
import jax.numpy as jnp
from jax.experimental import pallas as pl
from jax.experimental.pallas import tpu as pltpu

_MB = 1024 * 1024
_SINGLE_STEP_MAX_BYTES = 4 * _MB  # below this, one grid step beats pipelining


def _positional_encoding(d_model: int, max_len: int) -> jnp.ndarray:
    """Deterministic sinusoidal PE table, identical to the PyTorch __init__."""
    pos = jnp.arange(max_len, dtype=jnp.float32)[:, None]          # [max_len, 1]
    _2i = jnp.arange(0, d_model, 2, dtype=jnp.float32)             # [d_model/2]
    angle = pos / jnp.power(10000.0, _2i / d_model)                # [max_len, d_model/2]
    enc = jnp.zeros((max_len, d_model), dtype=jnp.float32)
    enc = enc.at[:, 0::2].set(jnp.sin(angle))
    enc = enc.at[:, 1::2].set(jnp.cos(angle))
    return enc


def _add2d_kernel(x_ref, pe_ref, o_ref):
    # All refs are 2-D (rows, 128-lane) tiles; batch dim is squeezed by the spec.
    o_ref[...] = x_ref[...] + pe_ref[...]


def _add_bcast_kernel(x_ref, pe_ref, o_ref):
    # Single-step path: x/o are [B, n_rows, 128], pe is [n_rows, 128].
    o_ref[...] = x_ref[...] + pe_ref[...][None, :, :]


def _vmem_budget():
    """Generation-aware VMEM limit and per-buffer tile target."""
    try:
        cap = int(pltpu.get_tpu_info().vmem_capacity_bytes)
    except Exception:
        cap = 64 * _MB  # conservative fallback (v7x-sized)
    limit = min(cap // 2, 64 * _MB)
    # 3 streams (x, pe, out), each double-buffered -> 6 * per_buf total; leave
    # generous headroom under `limit` on every generation.
    per_buf = 4 * _MB if cap >= 128 * _MB else 2 * _MB
    return limit, per_buf


def _sublane_align(dtype) -> int:
    """Minimum sublane multiple for full-width tiles at this dtype."""
    itemsize = jnp.dtype(dtype).itemsize
    return {4: 8, 2: 16, 1: 32}.get(itemsize, 8)


def _row_tile(n_rows: int, target_rows: int, align: int) -> int:
    """Pick an `align`-multiple (or full-extent) sublane tile size."""
    if n_rows <= align:
        return n_rows
    t = min(target_rows, n_rows)
    return max(align, (t // align) * align)


def transformer_embedding(x: jnp.ndarray, pe_table: jnp.ndarray) -> jnp.ndarray:
    """x: [B, S, D] float; pe_table: [max_len, D]. Returns x + PE[:S] (broadcast)."""
    B, S, D = x.shape
    if S > pe_table.shape[0]:
        raise ValueError(f"seq_len {S} exceeds max_len {pe_table.shape[0]}")
    # NOTE: pe is cast to x.dtype before the add; for bf16 x this adds in bf16,
    # a tiny numeric deviation from PyTorch's f32-promoted add.
    pe = pe_table[:S, :].astype(x.dtype)

    flat = S * D
    if flat % 128 != 0:
        # Lane-unaligned case: a Pallas output block narrower than 128 lanes
        # lowers to masked vst.msk partial stores (up to ~4x store penalty);
        # XLA's fused elementwise add already hits the HBM roofline here.
        # TODO(synk): pad d_model to a lane multiple upstream to reuse the kernel.
        return x + pe[None, :, :]

    itemsize = jnp.dtype(x.dtype).itemsize
    n_rows = flat // 128
    # Pure merge/split of contiguous trailing dims -> bitcast in HLO, no copy.
    x_v = x.reshape(B, n_rows, 128)
    pe_v = pe.reshape(n_rows, 128)

    vmem_limit, per_buf_bytes = _vmem_budget()
    align = _sublane_align(x.dtype)

    # Total resident footprint for a single-step launch: x + out + pe.
    footprint = (2 * B * n_rows + n_rows) * 128 * itemsize
    if footprint <= min(_SINGLE_STEP_MAX_BYTES, vmem_limit // 2):
        # Small/medium problem: per-step overhead (~0.35 us) dominates HBM
        # time, so run the whole broadcast add in one grid step.
        out = pl.pallas_call(
            _add_bcast_kernel,
            out_shape=jax.ShapeDtypeStruct((B, n_rows, 128), x.dtype),
            compiler_params=pltpu.CompilerParams(vmem_limit_bytes=vmem_limit),
        )(x_v, pe_v)
        return out.reshape(B, S, D)

    # Tiled streaming path: ~2-4 MiB per buffer (generation-aware) keeps the
    # fixed per-step cost at <~15% of HBM time even on v7x's 3.2 TB/s.
    target_rows = max(align, per_buf_bytes // (128 * itemsize))
    t_r = _row_tile(n_rows, target_rows, align)
    n_row_tiles = pl.cdiv(n_rows, t_r)
    if B == 1 and n_row_tiles < 2 and n_rows >= 2 * align:
        # v7x has 2 TensorCores per chip; keep >= 2 parallel grid steps so a
        # degenerate (1, 1) grid doesn't idle one core.
        t_r = max(align, (((n_rows + 1) // 2) // align) * align)
        n_row_tiles = pl.cdiv(n_rows, t_r)

    grid = (n_row_tiles, B)  # batch innermost -> PE tile stays VMEM-resident
    out = pl.pallas_call(
        _add2d_kernel,
        out_shape=jax.ShapeDtypeStruct((B, n_rows, 128), x.dtype),
        grid_spec=pltpu.PrefetchScalarGridSpec(
            num_scalar_prefetch=0,
            grid=grid,
            in_specs=[
                pl.BlockSpec((pl.Squeezed(), t_r, 128), lambda r, b: (b, r, 0)),
                pl.BlockSpec((t_r, 128), lambda r, b: (r, 0)),
            ],
            out_specs=pl.BlockSpec((pl.Squeezed(), t_r, 128), lambda r, b: (b, r, 0)),
        ),
        compiler_params=pltpu.CompilerParams(
            dimension_semantics=("parallel", "parallel"),
            vmem_limit_bytes=vmem_limit,
        ),
    )(x_v, pe_v)
    return out.reshape(B, S, D)


if __name__ == "__main__":
    # Module hyperparameters (small, consistent with the forward pass).
    vocab_size = 100
    d_model = 32
    max_len = 16

    batch = 2
    seq_len = 8

    key = jax.random.PRNGKey(0)
    k_x, k_emb, k_x2 = jax.random.split(key, 3)

    # Deterministic (unused) token-embedding weights, matching
    # nn.Embedding(vocab_size, d_model, padding_idx=1). The PyTorch forward
    # never applies self.tok_emb, so these are initialized but not used.
    tok_emb_weight = jax.random.normal(k_emb, (vocab_size, d_model), dtype=jnp.float32)
    tok_emb_weight = tok_emb_weight.at[1].set(0.0)  # padding_idx=1

    # Input x: already [B, S, D] floats (forward treats x itself as the token embedding).
    x = jax.random.normal(k_x, (batch, seq_len, d_model), dtype=jnp.float32)
    pe_table = _positional_encoding(d_model, max_len)

    out = jax.block_until_ready(transformer_embedding(x, pe_table))
    ref = x + pe_table[:seq_len, :][None, :, :]
    assert out.shape == (batch, seq_len, d_model)
    assert jnp.allclose(out, ref, atol=1e-6), "mismatch vs reference (small path)"

    # Secondary check that exercises the tiled streaming path (> 4 MiB footprint).
    d2, s2, b2, ml2 = 512, 1024, 2, 1024
    x2 = jax.random.normal(k_x2, (b2, s2, d2), dtype=jnp.float32)
    pe2 = _positional_encoding(d2, ml2)
    out2 = jax.block_until_ready(transformer_embedding(x2, pe2))
    ref2 = x2 + pe2[None, :, :]
    assert jnp.allclose(out2, ref2, atol=1e-6), "mismatch vs reference (tiled path)"

    print("KERNEL_OK")
</pallas_src>

<mosaic_0001>
module attributes {stable_mosaic.version = 11 : i64} {
  func.func @_add_bcast_kernel(%arg0: memref<2x2x128xf32, #tpu.memory_space<vmem>>, %arg1: memref<2x128xf32, #tpu.memory_space<vmem>>, %arg2: memref<2x2x128xf32, #tpu.memory_space<vmem>>) attributes {dimension_semantics = [], scalar_prefetch = 0 : i64, scratch_operands = 0 : i64, tpu.core_type = #tpu.core_type<tc>} {
    %c0 = arith.constant 0 : index
    %c0_0 = arith.constant 0 : index
    %c0_1 = arith.constant 0 : index
    %0 = vector.load %arg0[%c0, %c0_0, %c0_1] : memref<2x2x128xf32, #tpu.memory_space<vmem>>, vector<2x2x128xf32>
    %c0_2 = arith.constant 0 : index
    %c0_3 = arith.constant 0 : index
    %1 = vector.load %arg1[%c0_2, %c0_3] : memref<2x128xf32, #tpu.memory_space<vmem>>, vector<2x128xf32>
    %2 = vector.shape_cast %1 : vector<2x128xf32> to vector<1x2x128xf32>
    %3 = vector.broadcast %2 : vector<1x2x128xf32> to vector<2x2x128xf32>
    %4 = arith.addf %0, %3 : vector<2x2x128xf32>
    %c0_4 = arith.constant 0 : index
    %c0_5 = arith.constant 0 : index
    %c0_6 = arith.constant 0 : index
    %5 = vector.load %arg2[%c0_4, %c0_5, %c0_6] : memref<2x2x128xf32, #tpu.memory_space<vmem>>, vector<2x2x128xf32>
    tpu.vector_store %arg2[%c0_4, %c0_5, %c0_6], %4 {strides = array<i32>} : memref<2x2x128xf32, #tpu.memory_space<vmem>>, vector<2x2x128xf32>,
    return
  }
}

</mosaic_0001>

<bundles_post_ra>
// kernel: tpu_custom_call.1
= control target key start
LH: loop header
LB: loop body
LE: loop exit
PB: predicated region body
PF: predicated region fallthrough
CT: control target
= control target key end

     0   :  { %7 = vsyncpa [#allocation3], 0  ;;  %s169_s0 = inlined_call_operand.hbm [shape: f32[2,2,128], index: 0, kind: input, shape index: {}]   ;;  %s170_s1 = inlined_call_operand.hbm [shape: f32[2,128], index: 1, kind: input, shape index: {}]   ;;  %s171_s2 = inlined_call_operand.hbm [shape: f32[2,2,128], index: 2, kind: output, shape index: {}]  }
   0x1   :  { %8 = vsyncpa [#allocation6], 0 }
   0x2   :  { %9 = vsyncpa [#allocation4], 0  ;;  %s134_s9 = smov [#allocation2]  }
   0x3   :  { %s15_s10 = sshll.u32 %s134_s9, 4  ;;  %s16_s10 = int_to_ptr.vmem [resolvable:$true] %s15_s10 }
   0x4   :  { %s76_s11 = scalar_lea.vmem %s16_s10, 64  ;;  %p81_p1 = scmp.lt.s32.totalorder %s16_s10, %s16_s10 }
   0x5   :  { %p77_p0 = scmp.ne.s32.totalorder %s16_s10, %s76_s11  ;;  %p82_p2 = scmp.lt.s32.totalorder %s76_s11, %s76_s11 }
   0x7   :  { %p83_p3 = por %p82_p2, %p81_p1 }
   0x9   :  { %p84_p4 = pnand %p83_p3, %p77_p0 }
   0xb   :  { %87 = shalt.err (!%p84_p4)
}
   0xc   :  { %s135_s12 = smov 32   ;;  %s136_s13 = smov 2  }
   0xd   :  { %21 = dma.hbm_to_vmem [thread:$0]  %s169_s0, 64, %s16_s10, [#allocation3], %s135_s12, %s135_s12, %s136_s13  }
   0xe   :  { %s137_s16 = smov [#allocation5]  }
   0xf   :  { %s28_s17 = sshll.u32 %s137_s16, 4  ;;  %s29_s17 = int_to_ptr.vmem [resolvable:$true] %s28_s17 }
  0x10   :  { %s96_s18 = scalar_lea.vmem %s29_s17, 32  ;;  %p101_p6 = scmp.lt.s32.totalorder %s29_s17, %s29_s17 }
  0x11   :  { %p97_p5 = scmp.ne.s32.totalorder %s29_s17, %s96_s18  ;;  %p102_p7 = scmp.lt.s32.totalorder %s96_s18, %s96_s18 }
  0x13   :  { %p103_p8 = por %p102_p7, %p101_p6 }
  0x15   :  { %p104_p9 = pnand %p103_p8, %p97_p5 }
  0x17   :  { %107 = shalt.err (!%p104_p9)
}
  0x18   :  { %31 = dma.hbm_to_vmem [thread:$0]  %s170_s1, 32, %s29_s17, [#allocation6]  }
  0x19   :  { %128 = dma.done.wait [#allocation3], 64  }
  0x1a   :  { %129 = vsyncadd [#allocation3], 4294967232 }
  0x1b   :  { %130 = dma.done.wait [#allocation6], 32  }
  0x1c   :  { %131 = vsyncadd [#allocation6], 4294967264  ;;  %s138_s21 = smov [#allocation7]   ;;  %v38_v0 = vld [vmem:[#allocation2] sm:$0x3] }
  0x1d   :  { %s50_s0 = sshll.u32 %s138_s21, 4  ;;  %v40_v1 = vld [vmem:[#allocation5] sm:$0x3]  ;;  %v39_v2 = vld [vmem:[#allocation2 + $0x2] sm:$0x3]  ;;  %s51_s0 = int_to_ptr.vmem [resolvable:$true] %s50_s0 }
  0x1e   :  { %v41_v3 = vadd.f32 %v40_v1, %v38_v0  ;;  %v42_v4 = vadd.f32 %v40_v1, %v39_v2  ;;  %s108_s22 = scalar_lea.vmem %s51_s0, 64  ;;  %p113_p11 = scmp.lt.s32.totalorder %s51_s0, %s51_s0 }
  0x1f   :  { %p109_p10 = scmp.ne.s32.totalorder %s51_s0, %s108_s22  ;;  %p114_p12 = scmp.lt.s32.totalorder %s108_s22, %s108_s22 }
  0x20   :  { %43 = vst [vmem:[#allocation7] sm:$0x3] %v41_v3  ;;  %44 = vst [vmem:[#allocation7 + $0x2] sm:$0x3] %v42_v4 }
  0x21   :  { %p115_p13 = por %p114_p12, %p113_p11 }
  0x23   :  { %p116_p0 = pnand %p115_p13, %p109_p10 }
  0x25   :  { %119 = shalt.err (!%p116_p0)
}
  0x26   :  { %56 = dma.vmem_to_hbm [thread:$0]  %s51_s0, 64, %s171_s2, [#allocation4], %s135_s12, %s135_s12, %s136_s13  }
  0x27   :  { %132 = dma.done.wait [#allocation4], 64  }
  0x28   :  { %133 = vsyncadd [#allocation4], 4294967232 }
  0x29   :  { %60 = vsyncpa [#allocation3], 1 }
  0x2a   :  { %61 = vsyncpa [#allocation6], 1 }
  0x2b   :  { %62 = vsyncpa [#allocation4], 1 }

</bundles_post_ra>
